<compile_context>
chip_gen: v7x
topology: tpu7x:2x2x1
jax: 0.10.0
libtpu: 0.0.40
codegen_flags: <defaults>
</compile_context>

<pallas_src>
import functools
import math

import jax
import jax.numpy as jnp
from jax.experimental import pallas as pl
from jax.experimental.pallas import tpu as pltpu

_INV_SQRT2 = 1.0 / math.sqrt(2.0)


def _erf_f32(x):
    # Float32-accurate erf (Abramowitz & Stegun 7.1.26, max abs err ~1.5e-7, i.e.
    # float32 noise).  exp() rides the otherwise-idle EUP slot.
    # TODO(synk): switch to jax.lax.erf if/when Mosaic guarantees an erf_p lowering.
    a1 = 0.254829592
    a2 = -0.284496736
    a3 = 1.421413741
    a4 = -1.453152027
    a5 = 1.061405429
    p = 0.3275911
    ax = jnp.abs(x)
    t = 1.0 / (1.0 + p * ax)
    poly = ((((a5 * t + a4) * t + a3) * t + a2) * t + a1) * t
    y = 1.0 - poly * jnp.exp(-ax * ax)
    return jnp.where(x < 0.0, -y, y)


def _gelu_exact(x):
    return x * 0.5 * (1.0 + _erf_f32(x * _INV_SQRT2))


def _lm_head_kernel(x_ref, w1t_ref, b1_ref, g_ref, beta_ref, w2t_ref, b2_ref,
                    o_ref, *, eps):
    # x_ref:    (tm, H)   tile of flattened input rows (native dtype, e.g. f32/bf16)
    # w1t_ref:  (H, H)    dense weight, transposed (grid-invariant)
    # b1_ref:   (1, H)    dense bias (f32)
    # g_ref:    (1, H)    LayerNorm gamma (f32)
    # beta_ref: (1, H)    LayerNorm beta (f32)
    # w2t_ref:  (H, V)    decoder weight, transposed (grid-invariant)
    # b2_ref:   (1, V)    decoder bias (f32)
    x = x_ref[...]

    # dense: MXU matmul, operands in native dtype, f32 accumulation
    h = jnp.dot(x, w1t_ref[...], preferred_element_type=jnp.float32)
    h = h + b1_ref[...]

    # exact-erf gelu (f32 elementwise)
    h = _gelu_exact(h)

    # LayerNorm over feature dim (biased variance, eps inside sqrt)
    mu = jnp.mean(h, axis=-1, keepdims=True)
    d = h - mu
    var = jnp.mean(d * d, axis=-1, keepdims=True)
    hn = d * jax.lax.rsqrt(var + eps)
    hn = hn * g_ref[...] + beta_ref[...]

    # decoder: (tm, H) @ (H, V) + bias, lane-dense output (V multiple of 128)
    out = jnp.dot(hn.astype(w2t_ref.dtype), w2t_ref[...],
                  preferred_element_type=jnp.float32)
    out = out + b2_ref[...]
    o_ref[...] = out.astype(o_ref.dtype)


def _round_up(n, m):
    return ((n + m - 1) // m) * m


def visual_lm_prediction_head(x, w_dense, b_dense, ln_gamma, ln_beta,
                              w_decoder, b_decoder, *, eps=1e-12, tm=256):
    """x: (..., H); weights in PyTorch nn.Linear layout (out, in)."""
    H = x.shape[-1]
    V = w_decoder.shape[0]
    x2d = x.reshape(-1, H)
    M = x2d.shape[0]

    # Large row tiles (multiple of 8; default 256 ~ MXU-filling on v6e/v7x, also a
    # multiple of 128 for v5e), capped at the 8-aligned row count for small inputs.
    tm = max(8, min(tm, _round_up(M, 8)))
    Mp = _round_up(M, tm)
    if Mp != M:
        x2d = jnp.pad(x2d, ((0, Mp - M), (0, 0)))

    # Glue outside the hot path: pre-transpose weights to (in, out); MXU operands
    # keep the activation dtype, elementwise params go to f32.
    mxu_dtype = x.dtype
    w1t = jnp.transpose(w_dense).astype(mxu_dtype)     # (H, H)
    w2t = jnp.transpose(w_decoder).astype(mxu_dtype)   # (H, V)
    b1 = b_dense.astype(jnp.float32).reshape(1, H)
    g = ln_gamma.astype(jnp.float32).reshape(1, H)
    be = ln_beta.astype(jnp.float32).reshape(1, H)
    b2 = b_decoder.astype(jnp.float32).reshape(1, V)

    kernel = functools.partial(_lm_head_kernel, eps=float(eps))

    out2d = pl.pallas_call(
        kernel,
        out_shape=jax.ShapeDtypeStruct((Mp, V), x.dtype),
        grid_spec=pltpu.PrefetchScalarGridSpec(
            num_scalar_prefetch=0,
            grid=(Mp // tm,),
            in_specs=[
                pl.BlockSpec((tm, H), lambda i: (i, 0)),   # streamed input rows
                pl.BlockSpec((H, H), lambda i: (0, 0)),    # dense weight (invariant)
                pl.BlockSpec((1, H), lambda i: (0, 0)),    # dense bias
                pl.BlockSpec((1, H), lambda i: (0, 0)),    # LN gamma
                pl.BlockSpec((1, H), lambda i: (0, 0)),    # LN beta
                pl.BlockSpec((H, V), lambda i: (0, 0)),    # decoder weight (invariant)
                pl.BlockSpec((1, V), lambda i: (0, 0)),    # decoder bias
            ],
            out_specs=pl.BlockSpec((tm, V), lambda i: (i, 0)),
        ),
        compiler_params=pltpu.CompilerParams(
            dimension_semantics=("parallel",),
            # tile budget sized to stay well under v7x's 64 MiB physical VMEM
            vmem_limit_bytes=32 * 1024 * 1024,
        ),
    )(x2d, w1t, b1, g, be, w2t, b2)

    return out2d[:M].reshape(*x.shape[:-1], V)


def _reference(x, w_dense, b_dense, ln_gamma, ln_beta, w_decoder, b_decoder, eps):
    hp = jax.lax.Precision.HIGHEST
    h = jnp.dot(x, w_dense.T, precision=hp) + b_dense
    h = h * 0.5 * (1.0 + jax.scipy.special.erf(h / jnp.sqrt(2.0)))
    mu = jnp.mean(h, axis=-1, keepdims=True)
    var = jnp.mean((h - mu) ** 2, axis=-1, keepdims=True)
    h = (h - mu) / jnp.sqrt(var + eps) * ln_gamma + ln_beta
    return jnp.dot(h, w_decoder.T, precision=hp) + b_decoder


if __name__ == "__main__":
    key = jax.random.PRNGKey(0)
    B, S, H, V = 2, 8, 128, 768   # hidden_size=128 (lane-aligned), decoder out fixed at 768
    eps = 1e-12

    kx, kw1, kb1, kg, kbe, kw2 = jax.random.split(key, 6)
    x = jax.random.normal(kx, (B, S, H), dtype=jnp.float32)
    w_dense = jax.random.normal(kw1, (H, H), jnp.float32) / jnp.sqrt(H)
    b_dense = 0.02 * jax.random.normal(kb1, (H,), jnp.float32)
    ln_gamma = 1.0 + 0.1 * jax.random.normal(kg, (H,), jnp.float32)
    ln_beta = 0.1 * jax.random.normal(kbe, (H,), jnp.float32)
    w_decoder = jax.random.normal(kw2, (V, H), jnp.float32) / jnp.sqrt(H)
    b_decoder = jnp.zeros((V,), jnp.float32)   # module initializes the tied decoder bias to zeros

    out = visual_lm_prediction_head(x, w_dense, b_dense, ln_gamma, ln_beta,
                                    w_decoder, b_decoder, eps=eps)
    out = jax.block_until_ready(out)

    ref = _reference(x, w_dense, b_dense, ln_gamma, ln_beta,
                     w_decoder, b_decoder, eps)
    assert out.shape == (B, S, V)
    max_err = float(jnp.max(jnp.abs(out - ref)))
    assert jnp.allclose(out, ref, atol=2e-3, rtol=2e-3), f"mismatch vs reference, max_err={max_err}"

    print("KERNEL_OK")
</pallas_src>

<mosaic_0001>
module attributes {stable_mosaic.version = 11 : i64} {
  func.func @_lm_head_kernel(%arg0: i32, %arg1: memref<16x128xf32, #tpu.memory_space<vmem>>, %arg2: memref<128x128xf32, #tpu.memory_space<vmem>>, %arg3: memref<1x128xf32, #tpu.memory_space<vmem>>, %arg4: memref<1x128xf32, #tpu.memory_space<vmem>>, %arg5: memref<1x128xf32, #tpu.memory_space<vmem>>, %arg6: memref<128x768xf32, #tpu.memory_space<vmem>>, %arg7: memref<1x768xf32, #tpu.memory_space<vmem>>, %arg8: memref<16x768xf32, #tpu.memory_space<vmem>>) attributes {dimension_semantics = [#tpu.dimension_semantics<parallel>], iteration_bounds = array<i64: 1>, scalar_prefetch = 0 : i64, scratch_operands = 0 : i64, tpu.core_type = #tpu.core_type<tc>, window_params = [{transform_indices = @transform_0, window_bounds = array<i64: 16, 128>}, {pipeline_mode = #tpu.pipeline_mode<synchronous>, transform_indices = @transform_1, window_bounds = array<i64: 128, 128>}, {pipeline_mode = #tpu.pipeline_mode<synchronous>, transform_indices = @transform_2, window_bounds = array<i64: 1, 128>}, {pipeline_mode = #tpu.pipeline_mode<synchronous>, transform_indices = @transform_3, window_bounds = array<i64: 1, 128>}, {pipeline_mode = #tpu.pipeline_mode<synchronous>, transform_indices = @transform_4, window_bounds = array<i64: 1, 128>}, {pipeline_mode = #tpu.pipeline_mode<synchronous>, transform_indices = @transform_5, window_bounds = array<i64: 128, 768>}, {pipeline_mode = #tpu.pipeline_mode<synchronous>, transform_indices = @transform_6, window_bounds = array<i64: 1, 768>}, {transform_indices = @transform_7, window_bounds = array<i64: 16, 768>}]} {
    %c0 = arith.constant 0 : index
    %c0_0 = arith.constant 0 : index
    %0 = vector.load %arg1[%c0, %c0_0] : memref<16x128xf32, #tpu.memory_space<vmem>>, vector<16x128xf32>
    %c0_1 = arith.constant 0 : index
    %c0_2 = arith.constant 0 : index
    %1 = vector.load %arg2[%c0_1, %c0_2] : memref<128x128xf32, #tpu.memory_space<vmem>>, vector<128x128xf32>
    %cst = arith.constant dense<0.000000e+00> : vector<16x128xf32>
    %2 = tpu.matmul %0, %1, %cst {dimension_numbers = #tpu.dot_dimension_numbers<[1], [0], [0], [1], [0, 0, 1, 1], [], []>} : vector<16x128xf32>, vector<128x128xf32>, vector<16x128xf32> -> vector<16x128xf32>
    %c0_3 = arith.constant 0 : index
    %c0_4 = arith.constant 0 : index
    %3 = vector.load %arg3[%c0_3, %c0_4] : memref<1x128xf32, #tpu.memory_space<vmem>>, vector<1x128xf32>
    %4 = vector.broadcast %3 : vector<1x128xf32> to vector<16x128xf32>
    %5 = arith.addf %2, %4 : vector<16x128xf32>
    %cst_5 = arith.constant 5.000000e-01 : f32
    %6 = vector.broadcast %cst_5 : f32 to vector<16x128xf32>
    %7 = arith.mulf %5, %6 : vector<16x128xf32>
    %cst_6 = arith.constant 0.707106769 : f32
    %8 = vector.broadcast %cst_6 : f32 to vector<16x128xf32>
    %9 = arith.mulf %5, %8 : vector<16x128xf32>
    %10 = math.absf %9 : vector<16x128xf32>
    %cst_7 = arith.constant 0.327591091 : f32
    %11 = vector.broadcast %cst_7 : f32 to vector<16x128xf32>
    %12 = arith.mulf %11, %10 : vector<16x128xf32>
    %cst_8 = arith.constant 1.000000e+00 : f32
    %13 = vector.broadcast %cst_8 : f32 to vector<16x128xf32>
    %14 = arith.addf %13, %12 : vector<16x128xf32>
    %cst_9 = arith.constant 1.000000e+00 : f32
    %15 = vector.broadcast %cst_9 : f32 to vector<16x128xf32>
    %16 = arith.divf %15, %14 : vector<16x128xf32>
    %cst_10 = arith.constant 1.06140542 : f32
    %17 = vector.broadcast %cst_10 : f32 to vector<16x128xf32>
    %18 = arith.mulf %17, %16 : vector<16x128xf32>
    %cst_11 = arith.constant -1.45315206 : f32
    %19 = vector.broadcast %cst_11 : f32 to vector<16x128xf32>
    %20 = arith.addf %18, %19 : vector<16x128xf32>
    %21 = arith.mulf %20, %16 : vector<16x128xf32>
    %cst_12 = arith.constant 1.42141378 : f32
    %22 = vector.broadcast %cst_12 : f32 to vector<16x128xf32>
    %23 = arith.addf %21, %22 : vector<16x128xf32>
    %24 = arith.mulf %23, %16 : vector<16x128xf32>
    %cst_13 = arith.constant -0.284496725 : f32
    %25 = vector.broadcast %cst_13 : f32 to vector<16x128xf32>
    %26 = arith.addf %24, %25 : vector<16x128xf32>
    %27 = arith.mulf %26, %16 : vector<16x128xf32>
    %cst_14 = arith.constant 0.254829586 : f32
    %28 = vector.broadcast %cst_14 : f32 to vector<16x128xf32>
    %29 = arith.addf %27, %28 : vector<16x128xf32>
    %30 = arith.mulf %29, %16 : vector<16x128xf32>
    %cst_15 = arith.constant 0.000000e+00 : f32
    %31 = vector.broadcast %cst_15 : f32 to vector<16x128xf32>
    %32 = arith.subf %31, %10 : vector<16x128xf32>
    %33 = arith.mulf %32, %10 : vector<16x128xf32>
    %34 = math.exp %33 : vector<16x128xf32>
    %35 = arith.mulf %30, %34 : vector<16x128xf32>
    %cst_16 = arith.constant 1.000000e+00 : f32
    %36 = vector.broadcast %cst_16 : f32 to vector<16x128xf32>
    %37 = arith.subf %36, %35 : vector<16x128xf32>
    %cst_17 = arith.constant 0.000000e+00 : f32
    %38 = vector.broadcast %cst_17 : f32 to vector<16x128xf32>
    %39 = arith.cmpf olt, %9, %38 : vector<16x128xf32>
    %cst_18 = arith.constant 0.000000e+00 : f32
    %40 = vector.broadcast %cst_18 : f32 to vector<16x128xf32>
    %41 = arith.subf %40, %37 : vector<16x128xf32>
    %42 = arith.select %39, %41, %37 : vector<16x128xi1>, vector<16x128xf32>
    %cst_19 = arith.constant 1.000000e+00 : f32
    %43 = vector.broadcast %cst_19 : f32 to vector<16x128xf32>
    %44 = arith.addf %43, %42 : vector<16x128xf32>
    %45 = arith.mulf %7, %44 : vector<16x128xf32>
    %cst_20 = arith.constant dense<0.000000e+00> : vector<16xf32>
    %46 = vector.multi_reduction <add>, %45, %cst_20 [1] : vector<16x128xf32> to vector<16xf32>
    %47 = vector.shape_cast %46 : vector<16xf32> to vector<16x1xf32>
    %cst_21 = arith.constant 1.280000e+02 : f32
    %48 = vector.broadcast %cst_21 : f32 to vector<16x1xf32>
    %49 = arith.divf %47, %48 : vector<16x1xf32>
    %50 = vector.broadcast %49 : vector<16x1xf32> to vector<16x128xf32>
    %51 = arith.subf %45, %50 : vector<16x128xf32>
    %52 = arith.mulf %51, %51 : vector<16x128xf32>
    %cst_22 = arith.constant dense<0.000000e+00> : vector<16xf32>
    %53 = vector.multi_reduction <add>, %52, %cst_22 [1] : vector<16x128xf32> to vector<16xf32>
    %54 = vector.shape_cast %53 : vector<16xf32> to vector<16x1xf32>
    %cst_23 = arith.constant 1.280000e+02 : f32
    %55 = vector.broadcast %cst_23 : f32 to vector<16x1xf32>
    %56 = arith.divf %54, %55 : vector<16x1xf32>
    %cst_24 = arith.constant 9.99999996E-13 : f32
    %57 = vector.broadcast %cst_24 : f32 to vector<16x1xf32>
    %58 = arith.addf %56, %57 : vector<16x1xf32>
    %59 = math.rsqrt %58 : vector<16x1xf32>
    %60 = vector.broadcast %59 : vector<16x1xf32> to vector<16x128xf32>
    %61 = arith.mulf %51, %60 : vector<16x128xf32>
    %c0_25 = arith.constant 0 : index
    %c0_26 = arith.constant 0 : index
    %62 = vector.load %arg4[%c0_25, %c0_26] : memref<1x128xf32, #tpu.memory_space<vmem>>, vector<1x128xf32>
    %63 = vector.broadcast %62 : vector<1x128xf32> to vector<16x128xf32>
    %64 = arith.mulf %61, %63 : vector<16x128xf32>
    %c0_27 = arith.constant 0 : index
    %c0_28 = arith.constant 0 : index
    %65 = vector.load %arg5[%c0_27, %c0_28] : memref<1x128xf32, #tpu.memory_space<vmem>>, vector<1x128xf32>
    %66 = vector.broadcast %65 : vector<1x128xf32> to vector<16x128xf32>
    %67 = arith.addf %64, %66 : vector<16x128xf32>
    %c0_29 = arith.constant 0 : index
    %c0_30 = arith.constant 0 : index
    %68 = vector.load %arg6[%c0_29, %c0_30] : memref<128x768xf32, #tpu.memory_space<vmem>>, vector<128x768xf32>
    %cst_31 = arith.constant dense<0.000000e+00> : vector<16x768xf32>
    %69 = tpu.matmul %67, %68, %cst_31 {dimension_numbers = #tpu.dot_dimension_numbers<[1], [0], [0], [1], [0, 0, 1, 1], [], []>} : vector<16x128xf32>, vector<128x768xf32>, vector<16x768xf32> -> vector<16x768xf32>
    %c0_32 = arith.constant 0 : index
    %c0_33 = arith.constant 0 : index
    %70 = vector.load %arg7[%c0_32, %c0_33] : memref<1x768xf32, #tpu.memory_space<vmem>>, vector<1x768xf32>
    %71 = vector.broadcast %70 : vector<1x768xf32> to vector<16x768xf32>
    %72 = arith.addf %69, %71 : vector<16x768xf32>
    %c0_34 = arith.constant 0 : index
    %c0_35 = arith.constant 0 : index
    %73 = vector.load %arg8[%c0_34, %c0_35] : memref<16x768xf32, #tpu.memory_space<vmem>>, vector<16x768xf32>
    tpu.vector_store %arg8[%c0_34, %c0_35], %72 {strides = array<i32>} : memref<16x768xf32, #tpu.memory_space<vmem>>, vector<16x768xf32>,
    return
  }
  func.func @transform_0(%arg0: i32) -> (i32, i32) {
    %c0_i32 = arith.constant 0 : i32
    %c0_i32_0 = arith.constant 0 : i32
    return %arg0, %c0_i32 : i32, i32
  }
  func.func @transform_1(%arg0: i32) -> (i32, i32) {
    %c0_i32 = arith.constant 0 : i32
    %c0_i32_0 = arith.constant 0 : i32
    %c0_i32_1 = arith.constant 0 : i32
    return %c0_i32, %c0_i32_0 : i32, i32
  }
  func.func @transform_2(%arg0: i32) -> (i32, i32) {
    %c0_i32 = arith.constant 0 : i32
    %c0_i32_0 = arith.constant 0 : i32
    %c0_i32_1 = arith.constant 0 : i32
    return %c0_i32, %c0_i32_0 : i32, i32
  }
  func.func @transform_3(%arg0: i32) -> (i32, i32) {
    %c0_i32 = arith.constant 0 : i32
    %c0_i32_0 = arith.constant 0 : i32
    %c0_i32_1 = arith.constant 0 : i32
    return %c0_i32, %c0_i32_0 : i32, i32
  }
  func.func @transform_4(%arg0: i32) -> (i32, i32) {
    %c0_i32 = arith.constant 0 : i32
    %c0_i32_0 = arith.constant 0 : i32
    %c0_i32_1 = arith.constant 0 : i32
    return %c0_i32, %c0_i32_0 : i32, i32
  }
  func.func @transform_5(%arg0: i32) -> (i32, i32) {
    %c0_i32 = arith.constant 0 : i32
    %c0_i32_0 = arith.constant 0 : i32
    %c0_i32_1 = arith.constant 0 : i32
    return %c0_i32, %c0_i32_0 : i32, i32
  }
  func.func @transform_6(%arg0: i32) -> (i32, i32) {
    %c0_i32 = arith.constant 0 : i32
    %c0_i32_0 = arith.constant 0 : i32
    %c0_i32_1 = arith.constant 0 : i32
    return %c0_i32, %c0_i32_0 : i32, i32
  }
  func.func @transform_7(%arg0: i32) -> (i32, i32) {
    %c0_i32 = arith.constant 0 : i32
    %c0_i32_0 = arith.constant 0 : i32
    return %arg0, %c0_i32 : i32, i32
  }
}

</mosaic_0001>

<bundles_post_ra>
// kernel: tpu_custom_call.1
= control target key start
LH: loop header
LB: loop body
LE: loop exit
PB: predicated region body
PF: predicated region fallthrough
CT: control target
= control target key end

     0   :  { %12 = vsyncpa [#allocation3], 0  ;;  %s1094_s0 = inlined_call_operand.hbm [shape: f32[16,128], index: 0, kind: input, shape index: {}]   ;;  %s1095_s1 = inlined_call_operand.hbm [shape: f32[128,128], index: 1, kind: input, shape index: {}]   ;;  %s1096_s2 = inlined_call_operand.vmem [shape: f32[1,128], index: 2, kind: input, shape index: {}]   ;;  %s1097_s3 = inlined_call_operand.vmem [shape: f32[1,128], index: 3, kind: input, shape index: {}]   ;;  %s1098_s4 = inlined_call_operand.vmem [shape: f32[1,128], index: 4, kind: input, shape index: {}]   ;;  %s1099_s5 = inlined_call_operand.hbm [shape: f32[128,768], index: 5, kind: input, shape index: {}]   ;;  %s1100_s6 = inlined_call_operand.vmem [shape: f32[1,768], index: 6, kind: input, shape index: {}]   ;;  %s1101_s7 = inlined_call_operand.hbm [shape: f32[16,768], index: 7, kind: output, shape index: {}]  }
   0x1   :  { %13 = vsyncpa [#allocation6], 0 }
   0x2   :  { %14 = vsyncpa [#allocation4], 0  ;;  %s951_s24 = smov [#allocation5]   ;;  %s952_s26 = smov [#allocation2]  }
   0x3   :  { %s32_s25 = sshll.u32 %s951_s24, 4  ;;  %s20_s27 = sshll.u32 %s952_s26, 4  ;;  %s33_s25 = int_to_ptr.vmem [resolvable:$true] %s32_s25  ;;  %s1000_s27 = int_to_ptr.vmem [resolvable:$true] %s20_s27 }
   0x4   :  { %s857_s30 = scalar_lea.hbm %s1095_s1, 2048 }
   0x5   :  { %p858_p0 = scmp.ne.s32.totalorder %s1095_s1, %s857_s30  ;;  %p861_p1 = scmp.lt.u32.totalorder %s857_s30, %s1095_s1 }
   0x7   :  { %p863_p2 = pnand %p861_p1, %p858_p0 }
   0x9   :  { %866 = shalt.err (!%p863_p2)
}
   0xa   :  { %s867_s12 = scalar_lea.vmem %s33_s25, 2048  ;;  %p872_p4 = scmp.lt.s32.totalorder %s33_s25, %s33_s25 }
   0xb   :  { %p868_p3 = scmp.ne.s32.totalorder %s33_s25, %s867_s12  ;;  %p873_p5 = scmp.lt.s32.totalorder %s867_s12, %s867_s12 }
   0xd   :  { %p874_p6 = por %p873_p5, %p872_p4 }
   0xf   :  { %p875_p7 = pnand %p874_p6, %p868_p3 }
  0x11   :  { %878 = shalt.err (!%p875_p7)
}
  0x12   :  { %s953_s13 = smov 128   ;;  %s954_s14 = smov 8  }
  0x13   :  { %38 = dma.hbm_to_vmem [thread:$0]  %s1095_s1, 2048, %s33_s25, [#allocation6], %s953_s13, %s953_s13, %s954_s14  }
  0x14   :  { %s879_s19 = scalar_lea.hbm %s1094_s0, 256 }
  0x15   :  { %p880_p8 = scmp.ne.s32.totalorder %s1094_s0, %s879_s19  ;;  %p883_p9 = scmp.lt.u32.totalorder %s879_s19, %s1094_s0 }
  0x17   :  { %p885_p10 = pnand %p883_p9, %p880_p8 }
  0x19   :  { %888 = shalt.err (!%p885_p10)
}
  0x1a   :  { %s889_s24 = scalar_lea.vmem %s1000_s27, 256  ;;  %p894_p12 = scmp.lt.s32.totalorder %s1000_s27, %s1000_s27 }
  0x1b   :  { %p890_p11 = scmp.ne.s32.totalorder %s1000_s27, %s889_s24  ;;  %p895_p13 = scmp.lt.s32.totalorder %s889_s24, %s889_s24 }
  0x1d   :  { %p896_p0 = por %p895_p13, %p894_p12 }
  0x1f   :  { %p897_p1 = pnand %p896_p0, %p890_p11 }
  0x21   :  { %900 = shalt.err (!%p897_p1)
}
  0x22   :  { %26 = dma.hbm_to_vmem [thread:$0]  %s1094_s0, 256, %s1000_s27, [#allocation3], %s953_s13, %s953_s13, %s954_s14  }
  0x23   :  { %s955_s26 = smov [#allocation7]   ;;  %s901_s8 = scalar_lea.hbm %s1099_s5, 12288 }
  0x24   :  { %s50_s28 = sshll.u32 %s955_s26, 4  ;;  %p902_p2 = scmp.ne.s32.totalorder %s1099_s5, %s901_s8  ;;  %s51_s28 = int_to_ptr.vmem [resolvable:$true] %s50_s28 }
  0x25   :  { %p905_p3 = scmp.lt.u32.totalorder %s901_s8, %s1099_s5 }
  0x27   :  { %p907_p4 = pnand %p905_p3, %p902_p2 }
  0x29   :  { %910 = shalt.err (!%p907_p4)
}
  0x2a   :  { %s911_s15 = scalar_lea.vmem %s51_s28, 12288  ;;  %p916_p6 = scmp.lt.s32.totalorder %s51_s28, %s51_s28 }
  0x2b   :  { %p912_p5 = scmp.ne.s32.totalorder %s51_s28, %s911_s15  ;;  %p917_p7 = scmp.lt.s32.totalorder %s911_s15, %s911_s15 }
  0x2d   :  { %p918_p8 = por %p917_p7, %p916_p6 }
  0x2f   :  { %p919_p9 = pnand %p918_p8, %p912_p5 }
  0x31   :  { %922 = shalt.err (!%p919_p9)
}
  0x32   :  { %s956_s0 = smov 768   ;;  %s957_s27 = smov 48  }
  0x33   :  { %56 = dma.hbm_to_vmem [thread:$0]  %s1099_s5, 12288, %s51_s28, [#allocation6], %s956_s0, %s956_s0, %s957_s27  }
  0x34   :  { %945 = dma.done.wait [#allocation3], 256  }
  0x35   :  { %946 = vsyncadd [#allocation3], 4294967040 }
  0x36   :  { %947 = dma.done.wait [#allocation6], 14336  }
  0x37   :  { %948 = vsyncadd [#allocation6], 4294952960  ;;  %v70_v0 = vld [vmem:[#allocation5] sm:$0xff]  ;;  %v71_v1 = vld [vmem:[#allocation5 + $0x8] sm:$0xff] }
  0x38   :  { %v72_v2 = vld [vmem:[#allocation5 + $0x10] sm:$0xff]  ;;  %v708_v3 = vpack.c.bf16 %v71_v1, %v70_v0  ;;  %v73_v4 = vld [vmem:[#allocation5 + $0x18] sm:$0xff]  ;;  %v74_v6 = vld [vmem:[#allocation5 + $0x20] sm:$0xff] }
  0x39   :  { %v712_v5 = vpack.c.bf16 %v73_v4, %v72_v2  ;;  %v75_v7 = vld [vmem:[#allocation5 + $0x28] sm:$0xff]  ;;  %v68_v9 = vld [vmem:[#allocation2] sm:$0xff]  ;;  %v77_v11 = vld [vmem:[#allocation5 + $0x38] sm:$0xff] }
  0x3a   :  { %709 = vmatprep.subr.bf16.mxu0 %v708_v3  ;;  %v716_v8 = vpack.c.bf16 %v75_v7, %v74_v6  ;;  %v76_v10 = vld [vmem:[#allocation5 + $0x30] sm:$0xff]  ;;  %705 = vmatprep.mubr.f32.mxu0 %v68_v9  ;;  %v78_v13 = vld [vmem:[#allocation5 + $0x40] sm:$0xff]  ;;  %v79_v14 = vld [vmem:[#allocation5 + $0x48] sm:$0xff] }
  0x3b   :  { %711 = vmatpush3.bf16.msra.mxu0 %v708_v3  ;;  %v720_v12 = vpack.c.bf16 %v77_v11, %v76_v10  ;;  %v724_v15 = vpack.c.bf16 %v79_v14, %v78_v13  ;;  %v80_v16 = vld [vmem:[#allocation5 + $0x50] sm:$0xff]  ;;  %v81_v17 = vld [vmem:[#allocation5 + $0x58] sm:$0xff]  ;;  %v82_v19 = vld [vmem:[#allocation5 + $0x60] sm:$0xff] }
  0x3c   :  { %713 = vmatprep.subr.bf16.mxu0 %v712_v5  ;;  %v728_v18 = vpack.c.bf16 %v81_v17, %v80_v16  ;;  %v83_v20 = vld [vmem:[#allocation5 + $0x68] sm:$0xff]  ;;  %v84_v22 = vld [vmem:[#allocation5 + $0x70] sm:$0xff]  ;;  %v85_v23 = vld [vmem:[#allocation5 + $0x78] sm:$0xff] }
  0x3d   :  { %v732_v21 = vpack.c.bf16 %v83_v20, %v82_v19  ;;  %v736_v24 = vpack.c.bf16 %v85_v23, %v84_v22  ;;  %v69_v25 = vld [vmem:[#allocation2 + $0x8] sm:$0xff]  ;;  %v652_v26 = vld [vmem:[%s1096_s2] ss:$0 sm:$0xff]  ;;  %v264_v17 = vld [vmem:[#allocation7 + $0x8] sm:$0xff] }
  0x3e   :  { %v263_v19 = vld [vmem:[#allocation7] sm:$0xff]  ;;  %v266_v22 = vld [vmem:[#allocation7 + $0x18] sm:$0xff]  ;;  %v272_v23 = vld [vmem:[#allocation7 + $0x48] sm:$0xff] }
  0x3f   :  { %715 = vmatpush3.bf16.msra.mxu0 %v712_v5 }
  0x40   :  { %717 = vmatprep.subr.bf16.mxu0 %v716_v8 }
  0x43   :  { %719 = vmatpush3.bf16.msra.mxu0 %v716_v8 }
  0x44   :  { %721 = vmatprep.subr.bf16.mxu0 %v720_v12 }
  0x47   :  { %723 = vmatpush3.bf16.msra.mxu0 %v720_v12 }
  0x48   :  { %725 = vmatprep.subr.bf16.mxu0 %v724_v15 }
  0x4b   :  { %727 = vmatpush3.bf16.msra.mxu0 %v724_v15 }
  0x4c   :  { %729 = vmatprep.subr.bf16.mxu0 %v728_v18 }
  0x4f   :  { %731 = vmatpush3.bf16.msra.mxu0 %v728_v18  ;;  %v270_v18 = vld [vmem:[#allocation7 + $0x38] sm:$0xff] }
  0x50   :  { %733 = vmatprep.subr.bf16.mxu0 %v732_v21  ;;  %v740_v20 = vpack.c.bf16 %v270_v18, %v264_v17  ;;  %v313_v17 = vld [vmem:[#allocation7 + $0x190] sm:$0xff]  ;;  %v319_v18 = vld [vmem:[#allocation7 + $0x1c0] sm:$0xff] }
  0x52   :  { %741 = vmatprep.subr.bf16.mxu1 %v740_v20  ;;  %v790_v20 = vpack.c.bf16 %v319_v18, %v313_v17 }
  0x53   :  { %735 = vmatpush3.bf16.msra.mxu0 %v732_v21  ;;  %v269_v21 = vld [vmem:[#allocation7 + $0x30] sm:$0xff] }
  0x54   :  { %737 = vmatprep.subr.bf16.mxu0 %v736_v24 }
  0x57   :  { %739 = vmatpush3.bf16.msra.mxu0 %v736_v24  ;;  %v742_v24 = vpack.c.bf16 %v269_v21, %v263_v19  ;;  %v324_v21 = vld [vmem:[#allocation7 + $0x1e8] sm:$0xff] }
  0x59   :  { %743 = vmatpush1.bf16.msra.mxu1 %v742_v24  ;;  %v323_v24 = vld [vmem:[#allocation7 + $0x1e0] sm:$0xff] }
  0x5a   :  { %706 = vmatmul.mubr.f32.vlgmr.msra.gmra.mrb[0].mxu0 %v69_v25  ;;  %v772_v25 = vpack.c.bf16 %v272_v23, %v266_v22  ;;  %v330_v22 = vld [vmem:[#allocation7 + $0x218] sm:$0xff] }
  0x5b   :  { %v760_v23 = vpack.c.bf16 %v330_v22, %v324_v21  ;;  %v292_v21 = vld [vmem:[#allocation7 + $0xe8] sm:$0xff] }
  0x5c   :  { %773 = vmatprep.subr.bf16.mxu0 %v772_v25  ;;  %v329_v25 = vld [vmem:[#allocation7 + $0x210] sm:$0xff] }
 0x12d   :  { %v707_v27 = vpop.f32.mrb[0].mxu0 }
 0x12e   :  { %v165_v28 = vadd.f32 %v707_v27, %v652_v26  ;;  %v159_v29 = vpop.f32.mrb[1].mxu0  ;;  %v271_v27 = vld [vmem:[#allocation7 + $0x40] sm:$0xff] }
 0x12f   :  { %v160_v30 = vadd.f32 %v652_v26, %v159_v29  ;;  %v265_v26 = vld [vmem:[#allocation7 + $0x10] sm:$0xff]  ;;  %v276_v29 = vld [vmem:[#allocation7 + $0x68] sm:$0xff] }
 0x130   :  { %v171_v31 = vmul.f32 0.70710677, %v165_v28  ;;  %v169_v15 = vmul.f32 0.5, %v165_v28  ;;  %v281_v28 = vld [vmem:[#allocation7 + $0x90] sm:$0xff] }
 0x131   :  { %v170_v32 = vmul.f32 0.70710677, %v160_v30  ;;  %v168_v11 = vmul.f32 0.5, %v160_v30  ;;  %v774_v30 = vpack.c.bf16 %v271_v27, %v265_v26  ;;  %v326_v26 = vld [vmem:[#allocation7 + $0x1f8] sm:$0xff]  ;;  %v762_v27 = vpack.c.bf16 %v329_v25, %v323_v24 }
 0x132   :  { %v173_v33 = vand.u32 2147483647, %v171_v31  ;;  %vm213_vm0 = vcmp.lt.f32.partialorder %v171_v31, 0.0  ;;  %v282_v31 = vld [vmem:[#allocation7 + $0x98] sm:$0xff] }
 0x133   :  { %v172_v34 = vand.u32 2147483647, %v170_v32  ;;  %vm212_vm1 = vcmp.lt.f32.partialorder %v170_v32, 0.0  ;;  %v275_v32 = vld [vmem:[#allocation7 + $0x60] sm:$0xff]  ;;  %775 = vmatpush1.bf16.msra.mxu0 %v774_v30  ;;  %v325_v30 = vld [vmem:[#allocation7 + $0x1f0] sm:$0xff] }
 0x134   :  { %v175_v35 = vmul.f32 0.3275911, %v173_v33  ;;  %v201_v39 = vsub.f32 0.0, %v173_v33 }
 0x135   :  { %v174_v36 = vmul.f32 0.3275911, %v172_v34  ;;  %v200_v40 = vsub.f32 0.0, %v172_v34 }
 0x136   :  { %v177_v37 = vadd.f32 1.0, %v175_v35  ;;  %v203_v42 = vmul.f32 %v201_v39, %v173_v33  ;;  %v744_v33 = vpack.c.bf16 %v282_v31, %v276_v29  ;;  %v278_v35 = vld [vmem:[#allocation7 + $0x78] sm:$0xff]  ;;  %v283_v39 = vld [vmem:[#allocation7 + $0xa0] sm:$0xff]  ;;  %v332_v29 = vld [vmem:[#allocation7 + $0x228] sm:$0xff] }
 0x137   :  { %v176_v38 = vadd.f32 1.0, %v174_v36  ;;  %v202_v44 = vmul.f32 %v200_v40, %v172_v34  ;;  %v746_v34 = vpack.c.bf16 %v281_v28, %v275_v32  ;;  %v284_v36 = vld [vmem:[#allocation7 + $0xa8] sm:$0xff]  ;;  %v331_v31 = vld [vmem:[#allocation7 + $0x220] sm:$0xff]  ;;  %v792_v32 = vpack.c.bf16 %v332_v29, %v326_v26  ;;  %v310_v29 = vld [vmem:[#allocation7 + $0x178] sm:$0xff] }
 0x138   :  { %845 = vrcp.f32 %v177_v37  ;;  %v206_v48 = vmul.f32 1.442695, %v203_v42  ;;  %v277_v37 = vld [vmem:[#allocation7 + $0x70] sm:$0xff]  ;;  %v288_v40 = vld [vmem:[#allocation7 + $0xc8] sm:$0xff]  ;;  %745 = vmatprep.subr.bf16.mxu1 %v744_v33  ;;  %v794_v28 = vpack.c.bf16 %v331_v31, %v325_v30  ;;  %v291_v26 = vld [vmem:[#allocation7 + $0xe0] sm:$0xff] }
 0x139   :  { %847 = vrcp.f32 %v176_v38  ;;  %v204_v50 = vmul.f32 1.442695, %v202_v44  ;;  %v776_v38 = vpack.c.bf16 %v284_v36, %v278_v35  ;;  %v778_v42 = vpack.c.bf16 %v283_v39, %v277_v37  ;;  %v287_v44 = vld [vmem:[#allocation7 + $0xc0] sm:$0xff]  ;;  %747 = vmatpush1.bf16.msra.mxu1 %v746_v34  ;;  %v336_v33 = vld [vmem:[#allocation7 + $0x248] sm:$0xff]  ;;  %v342_v34 = vld [vmem:[#allocation7 + $0x278] sm:$0xff] }
 0x13a   :  { %849 = vpow2.f32 %v206_v48  ;;  %v289_v48 = vld [vmem:[#allocation7 + $0xd0] sm:$0xff]  ;;  %v335_v35 = vld [vmem:[#allocation7 + $0x240] sm:$0xff]  ;;  %v764_v36 = vpack.c.bf16 %v342_v34, %v336_v33  ;;  %v344_v39 = vld [vmem:[#allocation7 + $0x288] sm:$0xff] }
 0x13b   :  { %851 = vpow2.f32 %v204_v50  ;;  %777 = vmatprep.subr.bf16.mxu0 %v776_v38  ;;  %v341_v37 = vld [vmem:[#allocation7 + $0x270] sm:$0xff]  ;;  %v338_v38 = vld [vmem:[#allocation7 + $0x258] sm:$0xff]  ;;  %v316_v33 = vld [vmem:[#allocation7 + $0x1a8] sm:$0xff] }
 0x13c   :  { %779 = vmatpush1.bf16.msra.mxu0 %v778_v42  ;;  %v796_v42 = vpack.c.bf16 %v344_v39, %v338_v38  ;;  %v322_v34 = vld [vmem:[#allocation7 + $0x1d8] sm:$0xff]  ;;  %v321_v38 = vld [vmem:[#allocation7 + $0x1d0] sm:$0xff]  ;;  %v328_v39 = vld [vmem:[#allocation7 + $0x208] sm:$0xff] }
 0x142   :  { %v846_v41 = vpop.eup %845 }
 0x143   :  { %v848_v43 = vpop.eup %847  ;;  %v183_v45 = vmul.f32 1.0614054, %v846_v41 }
 0x144   :  { %v182_v46 = vmul.f32 1.0614054, %v848_v43  ;;  %v850_v0 = vpop.eup %849 }
 0x145   :  { %v185_v47 = vadd.f32 -1.4531521, %v183_v45  ;;  %v852_v2 = vpop.eup %851  ;;  %v293_v45 = vld [vmem:[#allocation7 + $0xf0] sm:$0xff] }
 0x146   :  { %v184_v49 = vadd.f32 -1.4531521, %v182_v46  ;;  %v290_v46 = vld [vmem:[#allocation7 + $0xd8] sm:$0xff]  ;;  %v750_v50 = vpack.c.bf16 %v293_v45, %v287_v44  ;;  %v343_v44 = vld [vmem:[#allocation7 + $0x280] sm:$0xff]  ;;  %v348_v45 = vld [vmem:[#allocation7 + $0x2a8] sm:$0xff] }
 0x147   :  { %v187_v51 = vmul.f32 %v846_v41, %v185_v47  ;;  %v296_v47 = vld [vmem:[#allocation7 + $0x108] sm:$0xff] }
 0x148   :  { %v186_v52 = vmul.f32 %v848_v43, %v184_v49  ;;  %v295_v49 = vld [vmem:[#allocation7 + $0x100] sm:$0xff] }
 0x149   :  { %v189_v53 = vadd.f32 1.4214138, %v187_v51  ;;  %v780_v51 = vpack.c.bf16 %v296_v47, %v290_v46  ;;  %v354_v47 = vld [vmem:[#allocation7 + $0x2d8] sm:$0xff] }
 0x14a   :  { %v188_v54 = vadd.f32 1.4214138, %v186_v52  ;;  %v782_v52 = vpack.c.bf16 %v295_v49, %v289_v48  ;;  %v347_v48 = vld [vmem:[#allocation7 + $0x2a0] sm:$0xff]  ;;  %v353_v49 = vld [vmem:[#allocation7 + $0x2d0] sm:$0xff] }
 0x14b   :  { %v191_v55 = vmul.f32 %v846_v41, %v189_v53  ;;  %781 = vmatprep.subr.bf16.mxu0 %v780_v51  ;;  %v350_v51 = vld [vmem:[#allocation7 + $0x2b8] sm:$0xff] }
 0x14c   :  { %v190_v56 = vmul.f32 %v848_v43, %v188_v54  ;;  %783 = vmatpush1.bf16.msra.mxu0 %v782_v52  ;;  %v356_v52 = vld [vmem:[#allocation7 + $0x2e8] sm:$0xff] }
 0x14d   :  { %v193_v57 = vadd.f32 -0.28449672, %v191_v55 }
 0x14e   :  { %v192_v58 = vadd.f32 -0.28449672, %v190_v56 }
 0x14f   :  { %v195_v59 = vmul.f32 %v846_v41, %v193_v57 }
 0x150   :  { %v194_v60 = vmul.f32 %v848_v43, %v192_v58 }
 0x151   :  { %v197_v61 = vadd.f32 0.2548296, %v195_v59 }
 0x152   :  { %v196_v62 = vadd.f32 0.2548296, %v194_v60 }
 0x153   :  { %v199_v63 = vmul.f32 %v846_v41, %v197_v61  ;;  %v294_v41 = vld [vmem:[#allocation7 + $0xf8] sm:$0xff]  ;;  %v300_v61 = vld [vmem:[#allocation7 + $0x128] sm:$0xff] }
 0x154   :  { %v198_v1 = vmul.f32 %v848_v43, %v196_v62  ;;  %v748_v43 = vpack.c.bf16 %v294_v41, %v288_v40  ;;  %v306_v62 = vld [vmem:[#allocation7 + $0x158] sm:$0xff]  ;;  %v958_v40 = vmov 0.0   ;;  %v766_v41 = vpack.c.bf16 %v341_v37, %v335_v35  ;;  %v315_v37 = vld [vmem:[#allocation7 + $0x1a0] sm:$0xff] }
 0x155   :  { %v209_v3 = vmul.f32 %v850_v0, %v199_v63  ;;  %v752_v63 = vpack.c.bf16 %v306_v62, %v300_v61  ;;  %v299_v0 = vld [vmem:[#allocation7 + $0x120] sm:$0xff]  ;;  %455 = vmatprep.mubr.f32.mxu1 %v958_v40  ;;  %532 = vmatprep.mubr.f32.mxu0 %v958_v40 }
 0x156   :  { %v208_v4 = vmul.f32 %v852_v2, %v198_v1  ;;  %749 = vmatprep.subr.bf16.mxu1 %v748_v43  ;;  %v305_v1 = vld [vmem:[#allocation7 + $0x150] sm:$0xff]  ;;  %v302_v2 = vld [vmem:[#allocation7 + $0x138] sm:$0xff] }
 0x157   :  { %v211_v5 = vsub.f32 1.0, %v209_v3  ;;  %751 = vmatpush1.bf16.msra.mxu1 %v750_v50  ;;  %v754_v3 = vpack.c.bf16 %v305_v1, %v299_v0  ;;  %v337_v43 = vld [vmem:[#allocation7 + $0x250] sm:$0xff]  ;;  %v768_v50 = vpack.c.bf16 %v354_v47, %v348_v45  ;;  %v346_v47 = vld [vmem:[#allocation7 + $0x298] sm:$0xff] }
 0x158   :  { %v210_v6 = vsub.f32 1.0, %v208_v4  ;;  %v308_v4 = vld [vmem:[#allocation7 + $0x168] sm:$0xff]  ;;  %753 = vmatprep.subr.bf16.mxu1 %v752_v63  ;;  %v798_v46 = vpack.c.bf16 %v343_v44, %v337_v43  ;;  %v327_v44 = vld [vmem:[#allocation7 + $0x200] sm:$0xff]  ;;  %v333_v45 = vld [vmem:[#allocation7 + $0x230] sm:$0xff] }
 0x159   :  { %v215_v7 = vsub.f32 0.0, %v211_v5 }
 0x15a   :  { %v214_v8 = vsub.f32 0.0, %v210_v6 }
 0x15b   :  { %v217_v10 = vsel %vm213_vm0, %v215_v7, %v211_v5  ;;  %v301_v5 = vld [vmem:[#allocation7 + $0x130] sm:$0xff]  ;;  %v784_v7 = vpack.c.bf16 %v308_v4, %v302_v2  ;;  %755 = vmatpush1.bf16.msra.mxu1 %v754_v3 }
 0x15c   :  { %v216_v9 = vsel %vm212_vm1, %v214_v8, %v210_v6  ;;  %v219_v14 = vadd.f32 1.0, %v217_v10  ;;  %v307_v6 = vld [vmem:[#allocation7 + $0x160] sm:$0xff]  ;;  %v318_v10 = vld [vmem:[#allocation7 + $0x1b8] sm:$0xff] }
 0x15d   :  { %v218_v12 = vadd.f32 1.0, %v216_v9  ;;  %v786_v8 = vpack.c.bf16 %v307_v6, %v301_v5  ;;  %v312_v9 = vld [vmem:[#allocation7 + $0x188] sm:$0xff]  ;;  %785 = vmatprep.subr.bf16.mxu0 %v784_v7  ;;  %v653_v6 = vld [vmem:[%s1097_s3] ss:$0 sm:$0xff] }
 0x15e   :  { %v221_v16 = vmul.f32 %v219_v14, %v169_v15  ;;  %v314_v14 = vld [vmem:[#allocation7 + $0x198] sm:$0xff] }
 0x15f   :  { %v220_v13 = vmul.f32 %v218_v12, %v168_v11  ;;  %v756_v11 = vpack.c.bf16 %v318_v10, %v312_v9  ;;  %v311_v12 = vld [vmem:[#allocation7 + $0x180] sm:$0xff]  ;;  %787 = vmatpush1.bf16.msra.mxu0 %v786_v8  ;;  %v273_v9 = vld [vmem:[#allocation7 + $0x50] sm:$0xff] }
 0x160   :  { %v267_v8 = vld [vmem:[#allocation7 + $0x20] sm:$0xff]  ;;  %v654_v10 = vld [vmem:[%s1098_s4] ss:$0 sm:$0xff] }
 0x161   :  { %222 = vadd.xlane.f32.xlu0 %v220_v13  ;;  %757 = vmatprep.subr.bf16.mxu1 %v756_v11  ;;  %v280_v11 = vld [vmem:[#allocation7 + $0x88] sm:$0xff] }
 0x165   :  { %224 = vadd.xlane.f32.xlu0 %v221_v16 }
 0x1ee   :  { %v223_v53 = vpop.xlane.xlu0 %222 }
 0x1ef   :  { %v227_v54 = vmul.f32 0.0078125, %v223_v53  ;;  %v349_v53 = vld [vmem:[#allocation7 + $0x2b0] sm:$0xff] }
 0x1f1   :  { %v1049_v55 = vsub.f32 %v220_v13, %v227_v54  ;;  %v317_v13 = vld [vmem:[#allocation7 + $0x1b0] sm:$0xff]  ;;  %v770_v54 = vpack.c.bf16 %v353_v49, %v347_v48  ;;  %v826_v48 = vpack.c.bf16 %v333_v45, %v327_v44 }
 0x1f2   :  { %v225_v56 = vpop.xlane.xlu0 %224  ;;  %v758_v15 = vpack.c.bf16 %v317_v13, %v311_v12  ;;  %v286_v12 = vld [vmem:[#allocation7 + $0xb8] sm:$0xff] }
 0x1f3   :  { %v228_v57 = vmul.f32 0.0078125, %v225_v56  ;;  %v231_v58 = vmul.f32 %v1049_v55, %v1049_v55  ;;  %v800_v56 = vpack.c.bf16 %v356_v52, %v350_v51  ;;  %v808_v17 = vpack.c.bf16 %v286_v12, %v280_v11  ;;  %v345_v51 = vld [vmem:[#allocation7 + $0x290] sm:$0xff]  ;;  %v352_v52 = vld [vmem:[#allocation7 + $0x2c8] sm:$0xff] }
 0x1f4   :  { %759 = vmatpush1.bf16.msra.mxu1 %v758_v15  ;;  %v806_v15 = vpack.c.bf16 %v273_v9, %v267_v8 }
 0x1f5   :  { %v1053_v59 = vsub.f32 %v221_v16, %v228_v57  ;;  %233 = vadd.xlane.f32.xlu1 %v231_v58  ;;  %v320_v16 = vld [vmem:[#allocation7 + $0x1c8] sm:$0xff]  ;;  %761 = vmatprep.subr.bf16.mxu1 %v760_v23  ;;  %v355_v57 = vld [vmem:[#allocation7 + $0x2e0] sm:$0xff] }
 0x1f6   :  { %v788_v19 = vpack.c.bf16 %v320_v16, %v314_v14  ;;  %v268_v58 = vld [vmem:[#allocation7 + $0x28] sm:$0xff]  ;;  %v802_v62 = vpack.c.bf16 %v355_v57, %v349_v53  ;;  %v358_v53 = vld [vmem:[#allocation7 + $0x2f8] sm:$0xff]  ;;  %v351_v57 = vld [vmem:[#allocation7 + $0x2c0] sm:$0xff] }
 0x1f7   :  { %v232_v60 = vmul.f32 %v1053_v59, %v1053_v59 }
 0x1f8   :  { %789 = vmatprep.subr.bf16.mxu0 %v788_v19  ;;  %763 = vmatpush1.bf16.msra.mxu1 %v762_v27  ;;  %v279_v19 = vld [vmem:[#allocation7 + $0x80] sm:$0xff]  ;;  %v304_v27 = vld [vmem:[#allocation7 + $0x148] sm:$0xff] }
 0x1f9   :  { %235 = vadd.xlane.f32.xlu1 %v232_v60  ;;  %791 = vmatpush1.bf16.msra.mxu0 %v790_v20  ;;  %v274_v60 = vld [vmem:[#allocation7 + $0x58] sm:$0xff]  ;;  %v285_v20 = vld [vmem:[#allocation7 + $0xb0] sm:$0xff]  ;;  %v816_v31 = vpack.c.bf16 %v310_v29, %v304_v27 }
 0x1fa   :  { %793 = vmatprep.subr.bf16.mxu0 %v792_v32  ;;  %765 = vmatprep.subr.bf16.mxu1 %v764_v36  ;;  %v804_v61 = vpack.c.bf16 %v274_v60, %v268_v58  ;;  %v810_v23 = vpack.c.bf16 %v285_v20, %v279_v19  ;;  %v303_v32 = vld [vmem:[#allocation7 + $0x140] sm:$0xff]  ;;  %v820_v36 = vpack.c.bf16 %v322_v34, %v316_v33  ;;  %v357_v58 = vld [vmem:[#allocation7 + $0x2f0] sm:$0xff] }
 0x1fb   :  { %v834_v60 = vpack.c.bf16 %v357_v58, %v351_v57 }
 0x1fc   :  { %767 = vmatpush1.bf16.msra.mxu1 %v766_v41  ;;  %v334_v41 = vld [vmem:[#allocation7 + $0x238] sm:$0xff] }
 0x1fd   :  { %795 = vmatpush1.bf16.msra.mxu0 %v794_v28  ;;  %769 = vmatprep.subr.bf16.mxu1 %v768_v50  ;;  %v309_v28 = vld [vmem:[#allocation7 + $0x170] sm:$0xff]  ;;  %v824_v43 = vpack.c.bf16 %v334_v41, %v328_v39  ;;  %v339_v50 = vld [vmem:[#allocation7 + $0x260] sm:$0xff] }
 0x1fe   :  { %797 = vmatprep.subr.bf16.mxu0 %v796_v42  ;;  %v818_v35 = vpack.c.bf16 %v309_v28, %v303_v32  ;;  %v822_v42 = vpack.c.bf16 %v321_v38, %v315_v37 }
 0x200   :  { %771 = vmatpush1.bf16.msra.mxu1 %v770_v54  ;;  %v830_v54 = vpack.c.bf16 %v345_v51, %v339_v50 }
 0x201   :  { %799 = vmatpush1.bf16.msra.mxu0 %v798_v46  ;;  %805 = vmatprep.subr.bf16.mxu1 %v804_v61  ;;  %v340_v46 = vld [vmem:[#allocation7 + $0x268] sm:$0xff]  ;;  %v361_v61 = vlaneseq }
 0x202   :  { %801 = vmatprep.subr.bf16.mxu0 %v800_v56  ;;  %v828_v49 = vpack.c.bf16 %v346_v47, %v340_v46  ;;  %v832_v56 = vpack.c.bf16 %v358_v53, %v352_v52 }
 0x205   :  { %803 = vmatpush1.bf16.msra.mxu0 %v802_v62  ;;  %v362_v62 = vshrl.u32 %v361_v61, 7 }
 0x282   :  { %v234_v63 = vpop.xlane.xlu1 %233 }
 0x283   :  { %v237_v0 = vmul.f32 0.0078125, %v234_v63  ;;  %v363_v63 = vsub.s32 0, %v362_v62 }
 0x285   :  { %v239_v1 = vadd.f32 1e-12, %v237_v0  ;;  %v371_v0 = vsub.s32 2, %v362_v62 }
 0x286   :  { %v236_v2 = vpop.xlane.xlu1 %235 }
 0x287   :  { %853 = vrsqrt.f32 %v239_v1  ;;  %v238_v3 = vmul.f32 0.0078125, %v236_v2  ;;  %v359_v1 = vld [vmem:[%s1100_s6] sm:$0x3f]  ;;  %v367_v2 = vsub.s32 1, %v362_v62  ;;  %s959_s6 = smov [#allocation8]  }
 0x288   :  { %s639_s20 = sshll.u32 %s959_s6, 4  ;;  %s640_s20 = int_to_ptr.vmem [resolvable:$true] %s639_s20 }
 0x289   :  { %v240_v4 = vadd.f32 1e-12, %v238_v3  ;;  %v375_v3 = vsub.s32 3, %v362_v62  ;;  %s923_s21 = scalar_lea.vmem %s640_s20, 1536  ;;  %p928_p11 = scmp.lt.s32.totalorder %s640_s20, %s640_s20 }
 0x28a   :  { %p924_p10 = scmp.ne.s32.totalorder %s640_s20, %s923_s21  ;;  %p929_p12 = scmp.lt.s32.totalorder %s923_s21, %s923_s21 }
 0x28b   :  { %855 = vrsqrt.f32 %v240_v4  ;;  %v364_v4 = vrot.slane %v359_v1, %v363_v63 }
 0x28c   :  { %p930_p13 = por %p929_p12, %p928_p11 }
 0x28e   :  { %p931_p0 = pnand %p930_p13, %p924_p10 }
 0x291   :  { %v854_v5 = vpop.eup %853 }
 0x292   :  { %v243_v7 = vmul.f32 %v854_v5, %v1049_v55  ;;  %v298_v55 = vld [vmem:[#allocation7 + $0x118] sm:$0xff]  ;;  %v372_v5 = vrot.slane %v359_v1, %v371_v0 }
 0x293   :  { %v812_v25 = vpack.c.bf16 %v298_v55, %v292_v21 }
 0x294   :  { %v252_v13 = vmul.f32 %v653_v6, %v243_v7  ;;  %v376_v7 = vrot.slane %v359_v1, %v375_v3 }
 0x295   :  { %v856_v14 = vpop.eup %855 }
 0x296   :  { %v1066_v16 = vadd.f32 %v654_v10, %v252_v13  ;;  %v244_v18 = vmul.f32 %v856_v14, %v1053_v59  ;;  %v297_v59 = vld [vmem:[#allocation7 + $0x110] sm:$0xff] }
 0x297   :  { %v814_v30 = vpack.c.bf16 %v297_v59, %v291_v26 }
 0x298   :  { %456 = vmatmul.mubr.f32.vlgmr.msra.gmra.mrb[0].mxu1 %v1066_v16  ;;  %533 = vmatmul.mubr.f32.vlgmr.msra.gmra.mrb[2].mxu0 %v1066_v16  ;;  %v253_v22 = vmul.f32 %v653_v6, %v244_v18  ;;  %v368_v6 = vrot.slane %v359_v1, %v367_v2 }
 0x299   :  { %807 = vmatpush1.bf16.msra.mxu1 %v806_v15  ;;  %461 = vmatprep.mubr.f32.mxu1 %v958_v40 }
 0x29a   :  { %538 = vmatprep.mubr.f32.mxu0 %v958_v40  ;;  %809 = vmatprep.subr.bf16.mxu1 %v808_v17  ;;  %v262_v24 = vadd.f32 %v654_v10, %v253_v22  ;;  %v379_v22 = vsub.s32 4, %v362_v62 }
 0x29c   :  { %462 = vmatmul.mubr.f32.gmra.mrb[2].mxu1 %v262_v24  ;;  %539 = vmatmul.mubr.f32.gmra.mrb[4].mxu0 %v262_v24 }
 0x29d   :  { %811 = vmatpush1.bf16.msra.mxu1 %v810_v23  ;;  %609 = vmatprep.mubr.f32.mxu1 %v958_v40  ;;  %v383_v23 = vsub.s32 5, %v362_v62 }
 0x29e   :  { %813 = vmatprep.subr.bf16.mxu1 %v812_v25 }
 0x29f   :  { %v384_v25 = vrot.slane %v359_v1, %v383_v23 }
 0x2a1   :  { %815 = vmatpush1.bf16.msra.mxu1 %v814_v30 }
 0x2a2   :  { %817 = vmatprep.subr.bf16.mxu1 %v816_v31 }
 0x2a5   :  { %819 = vmatpush1.bf16.msra.mxu1 %v818_v35 }
 0x2a6   :  { %821 = vmatprep.subr.bf16.mxu1 %v820_v36 }
 0x2a9   :  { %823 = vmatpush1.bf16.msra.mxu1 %v822_v42 }
 0x2aa   :  { %825 = vmatprep.subr.bf16.mxu1 %v824_v43 }
 0x2ad   :  { %827 = vmatpush1.bf16.msra.mxu1 %v826_v48 }
 0x2ae   :  { %829 = vmatprep.subr.bf16.mxu1 %v828_v49 }
 0x2b1   :  { %831 = vmatpush1.bf16.msra.mxu1 %v830_v54 }
 0x2b2   :  { %833 = vmatprep.subr.bf16.mxu1 %v832_v56 }
 0x2b5   :  { %835 = vmatpush1.bf16.msra.mxu1 %v834_v60 }
 0x2b8   :  { %610 = vmatmul.mubr.f32.vlgmr.msra.gmra.mrb[4].mxu1 %v1066_v16 }
 0x2b9   :  { %615 = vmatprep.mubr.f32.mxu1 %v958_v40 }
 0x2bc   :  { %616 = vmatmul.mubr.f32.gmra.mrb[6].mxu1 %v262_v24  ;;  %v380_v24 = vrot.slane %v359_v1, %v379_v22 }
 0x36b   :  { %v457_v8 = vpop.f32.mrb[0].mxu1  ;;  %v534_v9 = vpop.f32.mrb[2].mxu0 }
 0x36c   :  { %v458_v10 = vadd.f32 %v457_v8, %v364_v4  ;;  %v535_v11 = vadd.f32 %v534_v9, %v372_v5  ;;  %v459_v40 = vpop.f32.mrb[1].mxu1  ;;  %v536_v12 = vpop.f32.mrb[3].mxu0 }
 0x36d   :  { %v460_v13 = vadd.f32 %v459_v40, %v368_v6  ;;  %v537_v14 = vadd.f32 %v536_v12, %v376_v7 }
 0x36e   :  { %622 = vst [vmem:[#allocation8] sm:$0xff] %v458_v10  ;;  %624 = vst [vmem:[#allocation8 + $0x10] sm:$0xff] %v535_v11 }
 0x36f   :  { %623 = vst [vmem:[#allocation8 + $0x8] sm:$0xff] %v460_v13  ;;  %625 = vst [vmem:[#allocation8 + $0x18] sm:$0xff] %v537_v14  ;;  %v463_v15 = vpop.f32.mrb[2].mxu1  ;;  %v540_v16 = vpop.f32.mrb[4].mxu0 }
 0x370   :  { %v464_v17 = vadd.f32 %v463_v15, %v364_v4  ;;  %v541_v18 = vadd.f32 %v540_v16, %v372_v5  ;;  %v465_v19 = vpop.f32.mrb[3].mxu1  ;;  %v542_v20 = vpop.f32.mrb[5].mxu0 }
 0x371   :  { %v466_v21 = vadd.f32 %v465_v19, %v368_v6  ;;  %v543_v55 = vadd.f32 %v542_v20, %v376_v7 }
 0x372   :  { %628 = vst [vmem:[#allocation8 + $0x30] sm:$0xff] %v464_v17  ;;  %630 = vst [vmem:[#allocation8 + $0x40] sm:$0xff] %v541_v18 }
 0x373   :  { %629 = vst [vmem:[#allocation8 + $0x38] sm:$0xff] %v466_v21  ;;  %631 = vst [vmem:[#allocation8 + $0x48] sm:$0xff] %v543_v55 }
 0x38b   :  { %v611_v26 = vpop.f32.mrb[4].mxu1 }
 0x38c   :  { %v612_v59 = vadd.f32 %v611_v26, %v380_v24  ;;  %v613_v27 = vpop.f32.mrb[5].mxu1 }
 0x38d   :  { %v614_v29 = vadd.f32 %v613_v27, %v384_v25 }
 0x38e   :  { %626 = vst [vmem:[#allocation8 + $0x20] sm:$0xff] %v612_v59 }
 0x38f   :  { %627 = vst [vmem:[#allocation8 + $0x28] sm:$0xff] %v614_v29  ;;  %v617_v30 = vpop.f32.mrb[6].mxu1 }
 0x390   :  { %v618_v31 = vadd.f32 %v617_v30, %v380_v24  ;;  %v619_v32 = vpop.f32.mrb[7].mxu1 }
 0x391   :  { %v620_v28 = vadd.f32 %v619_v32, %v384_v25 }
 0x392   :  { %632 = vst [vmem:[#allocation8 + $0x50] sm:$0xff] %v618_v31 }
 0x393   :  { %633 = vst [vmem:[#allocation8 + $0x58] sm:$0xff] %v620_v28 }
 0x394   :  { %934 = shalt.err (!%p931_p0)
}
 0x395   :  { %s935_s24 = scalar_lea.hbm %s1101_s7, 1536 }
 0x396   :  { %p936_p1 = scmp.ne.s32.totalorder %s1101_s7, %s935_s24  ;;  %p939_p2 = scmp.lt.u32.totalorder %s935_s24, %s1101_s7 }
 0x398   :  { %p941_p3 = pnand %p939_p2, %p936_p1 }
 0x39a   :  { %944 = shalt.err (!%p941_p3)
}
 0x39b   :  { %645 = dma.vmem_to_hbm [thread:$0]  %s640_s20, 1536, %s1101_s7, [#allocation4], %s956_s0, %s956_s0, %s957_s27  }
 0x39c   :  { %949 = dma.done.wait [#allocation4], 1536  }
 0x39d   :  { %950 = vsyncadd [#allocation4], 4294965760 }
 0x39e   :  { %649 = vsyncpa [#allocation3], 1 }
 0x39f   :  { %650 = vsyncpa [#allocation6], 1 }
 0x3a0   :  { %651 = vsyncpa [#allocation4], 1 }

</bundles_post_ra>
